<compile_context>
chip_gen: v7x
topology: tpu7x:2x2x1
jax: 0.10.0
libtpu: 0.0.40
codegen_flags: <defaults>
</compile_context>

<pallas_src>
import functools

import jax
import jax.numpy as jnp
import numpy as np
from jax import lax
from jax.experimental import pallas as pl
from jax.experimental.pallas import tpu as pltpu

# Safe on v5e/v6e (128 MiB physical) and on v7x (64 MiB per TensorCore).
_VMEM_LIMIT = 48 * 1024 * 1024


# ----------------------------- Kernel 1: fused QKV projection ------------------------
def qkv_proj_kernel(x_ref, w_ref, b_ref, o_ref):
    # x_ref: (TM, D) compute dtype; w_ref: (1, D, TN) compute dtype; b_ref: (1, 1, TN) f32
    acc = jnp.dot(x_ref[...], w_ref[0], preferred_element_type=jnp.float32)   # (TM, TN) f32
    o_ref[0] = (acc + b_ref[0]).astype(o_ref.dtype)


# ----------------------------- Kernel 2: multi-head attention (per batch, per Q tile) -
def attn_kernel(q_ref, k_ref, v_ref, bias_ref, o_ref, *, n_heads, head_w,
                approx_recip=True):
    q = q_ref[0, 0]            # (TQ, D) compute dtype, Q already pre-scaled by 1/sqrt(W)
    k = k_ref[0, 0]            # (S, D)  compute dtype
    v = v_ref[0, 0]            # (S, D)  compute dtype
    bias = bias_ref[0]         # (1, S)  additive mask bias, f32

    for h in range(n_heads):   # static unroll; one head's intermediates live at a time
        lo = h * head_w
        qh = q[:, lo:lo + head_w]                  # (TQ, W)
        kh = k[:, lo:lo + head_w]                  # (S, W)
        vh = v[:, lo:lo + head_w]                  # (S, W)

        # scores = qh @ kh^T without materializing a transpose of kh.
        scores = lax.dot_general(qh, kh, (((1,), (1,)), ((), ())),
                                 preferred_element_type=jnp.float32)   # (TQ, S) f32
        scores = scores + bias                                         # broadcast over rows

        # numerically-stable softmax (f32); denominator via EUP approx reciprocal
        scores = scores - jnp.max(scores, axis=-1, keepdims=True)
        p = jnp.exp(scores)
        denom = jnp.sum(p, axis=-1, keepdims=True)
        if approx_recip:
            p = p * pl.reciprocal(denom, approx=True)
        else:
            p = p / denom

        oh = jnp.dot(p.astype(vh.dtype), vh,
                     preferred_element_type=jnp.float32)               # (TQ, W) f32

        # write straight into the lane-dense (TQ, D) output block (no concat, no live list)
        o_ref[0, :, lo:lo + head_w] = oh.astype(o_ref.dtype)


# ----------------------------- Wrapper ------------------------------------------------
def mhsa_forward(x, mask, params, n_heads, *, compute_dtype=jnp.bfloat16,
                 approx_recip=True):
    """x: (B, S, D) f32, mask: (B, S) f32. Returns h: (B, S, D) f32."""
    B, S, D = x.shape
    H = n_heads
    W = D // H
    assert H * W == D

    scale = 1.0 / float(np.sqrt(W))
    itemsize = jnp.dtype(compute_dtype).itemsize

    # Stack the three projection weights as (3, D, D) (nn.Linear: y = x @ W^T + b) and fold the
    # 1/sqrt(W) scale into the Q projection weights/bias (scaled in f32, then cast).
    w_stack = jnp.stack(
        [params["wq"].T * scale, params["wk"].T, params["wv"].T], axis=0
    ).astype(compute_dtype)                                            # (3, D, D)
    b_stack = jnp.stack(
        [params["bq"] * scale, params["bk"], params["bv"]], axis=0
    ).reshape(3, 1, D).astype(jnp.float32)                             # (3, 1, D)

    N = B * S
    x2d = x.reshape(N, D).astype(compute_dtype)

    # Row tile (multiple of 8, or full N when small) and output-column tile (full D or 256).
    TM = N if N <= 512 else 512
    TN = D if D <= 256 else 256

    qkv = pl.pallas_call(
        qkv_proj_kernel,
        grid=(pl.cdiv(N, TM), 3, pl.cdiv(D, TN)),
        in_specs=[
            pl.BlockSpec((TM, D), lambda i, p, n: (i, 0)),       # x row tile, resident over (p,n)
            pl.BlockSpec((1, D, TN), lambda i, p, n: (p, 0, n)), # streamed weight column tiles
            pl.BlockSpec((1, 1, TN), lambda i, p, n: (p, 0, n)), # streamed bias tiles
        ],
        out_specs=pl.BlockSpec((1, TM, TN), lambda i, p, n: (p, i, n)),
        out_shape=jax.ShapeDtypeStruct((3, N, D), compute_dtype),
        compiler_params=pltpu.CompilerParams(
            dimension_semantics=("parallel", "parallel", "parallel"),
            vmem_limit_bytes=_VMEM_LIMIT),
        cost_estimate=pl.CostEstimate(
            flops=2 * N * D * 3 * D,
            transcendentals=0,
            bytes_accessed=(N * D + 3 * D * D + 3 * N * D) * itemsize + 3 * D * 4),
    )(x2d, w_stack, b_stack)

    # Free reshape (splits the contiguous row dim only) — no relayout, no extra HBM pass.
    qkv = qkv.reshape(3, B, S, D)

    # Precompute the additive mask bias once (saves mul+sub per score tile in-kernel).
    mask_bias = (-10000.0 * (1.0 - mask.astype(jnp.float32))).reshape(B, 1, S)

    # Query tile: bounds live score matrix to (TQ, S) per head, gives megacore units on v7x.
    TQ = S if S <= 256 else 256

    out = pl.pallas_call(
        functools.partial(attn_kernel, n_heads=H, head_w=W, approx_recip=approx_recip),
        grid=(B, pl.cdiv(S, TQ)),
        in_specs=[
            pl.BlockSpec((1, 1, TQ, D), lambda b, qi: (0, b, qi, 0)),  # streamed Q tiles
            pl.BlockSpec((1, 1, S, D), lambda b, qi: (1, b, 0, 0)),    # K slab, resident per batch
            pl.BlockSpec((1, 1, S, D), lambda b, qi: (2, b, 0, 0)),    # V slab, resident per batch
            pl.BlockSpec((1, 1, S), lambda b, qi: (b, 0, 0)),          # mask bias, f32
        ],
        out_specs=pl.BlockSpec((1, TQ, D), lambda b, qi: (b, qi, 0)),
        out_shape=jax.ShapeDtypeStruct((B, S, D), jnp.float32),
        compiler_params=pltpu.CompilerParams(
            dimension_semantics=("parallel", "parallel"),
            vmem_limit_bytes=_VMEM_LIMIT),
        cost_estimate=pl.CostEstimate(
            flops=4 * B * H * S * S * W,
            transcendentals=B * H * S * S,
            bytes_accessed=3 * B * S * D * itemsize + B * S * 4 + B * S * D * 4),
    )(qkv, qkv, qkv, mask_bias)

    return out                       # already (B, S, D); no merge transpose needed


# ----------------------------- Parameter init + reference ----------------------------
def init_params(key, dim):
    ks = jax.random.split(key, 6)
    s = 0.02
    return {
        "wq": jax.random.normal(ks[0], (dim, dim), jnp.float32) * s,
        "bq": jax.random.normal(ks[1], (dim,), jnp.float32) * s,
        "wk": jax.random.normal(ks[2], (dim, dim), jnp.float32) * s,
        "bk": jax.random.normal(ks[3], (dim,), jnp.float32) * s,
        "wv": jax.random.normal(ks[4], (dim, dim), jnp.float32) * s,
        "bv": jax.random.normal(ks[5], (dim,), jnp.float32) * s,
    }


def ref_mhsa(x, mask, p, n_heads):
    Bq, Sq, Dq = x.shape
    Wd = Dq // n_heads
    q = x @ p["wq"].T + p["bq"]
    k = x @ p["wk"].T + p["bk"]
    v = x @ p["wv"].T + p["bv"]
    sh = lambda t: t.reshape(Bq, Sq, n_heads, Wd).transpose(0, 2, 1, 3)
    q, k, v = sh(q), sh(k), sh(v)
    sc = q @ k.transpose(0, 1, 3, 2) / np.sqrt(Wd)
    sc = sc - 10000.0 * (1.0 - mask[:, None, None, :])
    sc = jax.nn.softmax(sc, axis=-1)
    h = (sc @ v).transpose(0, 2, 1, 3).reshape(Bq, Sq, Dq)
    return h


if __name__ == "__main__":
    B, S, D, H = 2, 8, 32, 4

    key = jax.random.PRNGKey(0)
    kx, km, kp = jax.random.split(key, 3)

    x = jax.random.normal(kx, (B, S, D), jnp.float32)
    # binary mask (1 = keep, 0 = masked), last position of batch 1 masked out
    mask = jnp.ones((B, S), jnp.float32).at[1, -1].set(0.0)

    params = init_params(kp, D)

    expected = ref_mhsa(x, mask, params, H)

    # default path: bf16 MXU operands with f32 accumulation (softmax / mask stay f32)
    out_bf16 = mhsa_forward(x, mask, params, n_heads=H)
    out_bf16 = jax.block_until_ready(out_bf16)
    assert out_bf16.shape == (B, S, D)
    np.testing.assert_allclose(np.asarray(out_bf16), np.asarray(expected), rtol=5e-2, atol=5e-3)

    # f32 MXU path (parity check)
    out_f32 = mhsa_forward(x, mask, params, n_heads=H, compute_dtype=jnp.float32)
    out_f32 = jax.block_until_ready(out_f32)
    assert out_f32.shape == (B, S, D)
    np.testing.assert_allclose(np.asarray(out_f32), np.asarray(expected), rtol=5e-3, atol=5e-4)

    print("KERNEL_OK")
</pallas_src>

<mosaic_0001>
module attributes {stable_mosaic.version = 11 : i64} {
  func.func @qkv_proj_kernel(%arg0: i32, %arg1: i32, %arg2: i32, %arg3: memref<16x32xbf16, #tpu.memory_space<vmem>>, %arg4: memref<1x32x32xbf16, #tpu.memory_space<vmem>>, %arg5: memref<1x1x32xf32, #tpu.memory_space<vmem>>, %arg6: memref<1x16x32xbf16, #tpu.memory_space<vmem>>) attributes {dimension_semantics = [#tpu.dimension_semantics<parallel>, #tpu.dimension_semantics<parallel>, #tpu.dimension_semantics<parallel>], iteration_bounds = array<i64: 1, 3, 1>, scalar_prefetch = 0 : i64, scratch_operands = 0 : i64, tpu.core_type = #tpu.core_type<tc>, window_params = [{transform_indices = @transform_0, window_bounds = array<i64: 16, 32>}, {transform_indices = @transform_1, window_bounds = array<i64: 1, 32, 32>}, {transform_indices = @transform_2, window_bounds = array<i64: 1, 1, 32>}, {transform_indices = @transform_3, window_bounds = array<i64: 1, 16, 32>}]} {
    %c0 = arith.constant 0 : index
    %c0_0 = arith.constant 0 : index
    %0 = vector.load %arg3[%c0, %c0_0] : memref<16x32xbf16, #tpu.memory_space<vmem>>, vector<16x32xbf16>
    %c0_1 = arith.constant 0 : index
    %c0_2 = arith.constant 0 : index
    %c0_3 = arith.constant 0 : index
    %1 = vector.load %arg4[%c0_1, %c0_2, %c0_3] : memref<1x32x32xbf16, #tpu.memory_space<vmem>>, vector<1x32x32xbf16>
    %2 = vector.shape_cast %1 : vector<1x32x32xbf16> to vector<32x32xbf16>
    %cst = arith.constant dense<0.000000e+00> : vector<16x32xf32>
    %3 = tpu.matmul %0, %2, %cst {dimension_numbers = #tpu.dot_dimension_numbers<[1], [0], [0], [1], [0, 0, 1, 1], [], []>} : vector<16x32xbf16>, vector<32x32xbf16>, vector<16x32xf32> -> vector<16x32xf32>
    %c0_4 = arith.constant 0 : index
    %c0_5 = arith.constant 0 : index
    %c0_6 = arith.constant 0 : index
    %4 = vector.load %arg5[%c0_4, %c0_5, %c0_6] : memref<1x1x32xf32, #tpu.memory_space<vmem>>, vector<1x1x32xf32>
    %5 = vector.shape_cast %4 : vector<1x1x32xf32> to vector<1x32xf32>
    %6 = vector.broadcast %5 : vector<1x32xf32> to vector<16x32xf32>
    %7 = arith.addf %3, %6 : vector<16x32xf32>
    %8 = arith.truncf %7 : vector<16x32xf32> to vector<16x32xbf16>
    %c0_7 = arith.constant 0 : index
    %c0_8 = arith.constant 0 : index
    %c0_9 = arith.constant 0 : index
    %9 = vector.load %arg6[%c0_7, %c0_8, %c0_9] : memref<1x16x32xbf16, #tpu.memory_space<vmem>>, vector<1x16x32xbf16>
    %10 = vector.shape_cast %9 : vector<1x16x32xbf16> to vector<16x32xbf16>
    %11 = vector.shape_cast %8 : vector<16x32xbf16> to vector<1x16x32xbf16>
    tpu.vector_store %arg6[%c0_7, %c0_8, %c0_9], %11 {strides = array<i32>} : memref<1x16x32xbf16, #tpu.memory_space<vmem>>, vector<1x16x32xbf16>,
    return
  }
  func.func @transform_0(%arg0: i32, %arg1: i32, %arg2: i32) -> (i32, i32) {
    %c0_i32 = arith.constant 0 : i32
    %c0_i32_0 = arith.constant 0 : i32
    return %arg0, %c0_i32 : i32, i32
  }
  func.func @transform_1(%arg0: i32, %arg1: i32, %arg2: i32) -> (i32, i32, i32) {
    %c0_i32 = arith.constant 0 : i32
    %c0_i32_0 = arith.constant 0 : i32
    return %arg1, %c0_i32, %arg2 : i32, i32, i32
  }
  func.func @transform_2(%arg0: i32, %arg1: i32, %arg2: i32) -> (i32, i32, i32) {
    %c0_i32 = arith.constant 0 : i32
    %c0_i32_0 = arith.constant 0 : i32
    return %arg1, %c0_i32, %arg2 : i32, i32, i32
  }
  func.func @transform_3(%arg0: i32, %arg1: i32, %arg2: i32) -> (i32, i32, i32) {
    %c0_i32 = arith.constant 0 : i32
    return %arg1, %arg0, %arg2 : i32, i32, i32
  }
}

</mosaic_0001>

<bundles_post_ra>
// kernel: tpu_custom_call.1
= control target key start
LH: loop header
LB: loop body
LE: loop exit
PB: predicated region body
PF: predicated region fallthrough
CT: control target
= control target key end

     0   :  { %8 = vsyncpa [#allocation3], 0  ;;  %s1010_s0 = inlined_call_operand.hbm [shape: bf16[16,32], index: 0, kind: input, shape index: {}]   ;;  %s1011_s1 = inlined_call_operand.hbm [shape: bf16[3,32,32], index: 1, kind: input, shape index: {}]   ;;  %s1012_s2 = inlined_call_operand.vmem [shape: f32[3,1,32], index: 2, kind: input, shape index: {}]   ;;  %s1013_s3 = inlined_call_operand.hbm [shape: bf16[3,16,32], index: 3, kind: output, shape index: {}]  }
   0x1   :  { %9 = vsyncpa [#allocation6], 0 }
   0x2   :  { %11 = vsyncpa [#allocation6 + $0x1], 0 }
   0x3   :  { %12 = vsyncpa [#allocation4], 0 }
   0x4   :  { %14 = vsyncpa [#allocation4 + $0x1], 0  ;;  %s781_s12 = smov 0   ;;  %s783_s13 = smov 0  }
   0x5   :  { %s785_s14 = smov 0   ;;  %s787_s15 = smov 0  }
   0x6   :  { %s789_s16 = smov 0   ;;  %s791_s17 = smov 0  }
   0x7 LB: > { %s485_s18 = sadd.s32 4294967295, %s750_s17   ;;  %s486_s19 = sadd.s32 4294967294, %s750_s17   ;;  %s750_s17 = sphi %s791_s17, %s20_s17   ;;  %s746_s16 = sphi %s789_s16, %s1036_s16   ;;  %s742_s15 = sphi %s787_s15, %s1035_s15   ;;  %s738_s14 = sphi %s785_s14, %s1034_s14   ;;  %s734_s13 = sphi %s783_s13, %s1033_s13   ;;  %s730_s12 = sphi %s781_s12, %s1032_s12  }
   0x8   : > { %p87_p0 = scmp.ne.s32.totalorder %s734_s13, %s730_s12  ;;  %p815_p1 = scmp.eq.s32.totalorder %s485_s18, 0 }
   0x9   : > { %p819_p2 = scmp.eq.s32.totalorder %s485_s18, 2  ;;  %p149_p3 = scmp.eq.s32.totalorder %s486_s19, 2 }
   0xa   : > { %s1018_s20 = scalar_select %p815_p1, 1, 0 }
   0xb   : > { %s1019_s21 = scalar_select %p819_p2, 1, 0 }
   0xc   : > { %p825_p4 = por %p815_p1, %p87_p0  ;;  %p487_p5 = scmp.ge.s32.totalorder %s750_s17, 1 }
   0xd   : > { %p830_p6 = por %p149_p3, %p87_p0  ;;  %p156_p7 = scmp.lt.s32.totalorder %s750_s17, 4 }
   0xe   : > { %s1020_s22 = scalar_select %p825_p4, 1, 0 }
   0xf   : > { %s1021_s23 = scalar_select %p830_p6, 1, 0 }
  0x10   : > { %p835_p8 = pnand %p487_p5, %p156_p7  ;;  %s752_s25 = smov [#allocation2]  }
  0x11   : > { %s171_s26 = sshll.u32 %s752_s25, 4  ;;  %s35_s28 = sadd.s32 1, %s746_s16  ;;  %s172_s26 = int_to_ptr.vmem [resolvable:$true] %s171_s26 }
  0x12   : > { %s1022_s24 = scalar_select %p835_p8, 1, 0 }
  0x13   : > { %p532_p9 = pneg %p835_p8  ;;  %s606_s4 = scalar_lea.hbm %s1010_s0, 128 }
  0x14   : > { %p607_p11 = scmp.ne.s32.totalorder %s1010_s0, %s606_s4  ;;  %p613_p3 = scmp.lt.u32.totalorder %s606_s4, %s1010_s0 }
  0x15   : > { %p843_p10 = pnand %p532_p9, %p815_p1 }
  0x17   : > { %p608_p12 = pneg %p843_p10 }
  0x19   : > { %p609_p13 = pnand %p608_p12, %p607_p11 }
  0x1b   : > { %p610_p0 = pneg %p609_p13 }
  0x1d   : > { %p615_p5 = pnand %p613_p3, %p610_p0 }
  0x1f   : > { %618 = shalt.err (!%p615_p5)
}
  0x20   : > { %s619_s9 = scalar_lea.vmem %s172_s26, 128  ;;  %p627_p4 = scmp.lt.s32.totalorder %s172_s26, %s172_s26 }
  0x21   : > { %p620_p7 = scmp.ne.s32.totalorder %s172_s26, %s619_s9  ;;  %p628_p1 = scmp.lt.s32.totalorder %s619_s9, %s619_s9 }
  0x23   : > { %p622_p9 = pnand %p620_p7, %p608_p12  ;;  %p629_p8 = por %p628_p1, %p627_p4 }
  0x25   : > { %p623_p6 = pneg %p622_p9 }
  0x27   : > { %p630_p2 = pnand %p629_p8, %p623_p6 }
  0x29   : > { %633 = shalt.err (!%p630_p2)
}
  0x2a   : > { %s753_s10 = smov 64   ;;  %s754_s11 = smov 4  }
  0x2b   : > { %535 = dma.hbm_to_vmem [thread:$0]  (!%p843_p10), %s1010_s0, 128, %s172_s26, [#allocation3], %s753_s10, %s753_s10, %s754_s11  }
  0x2c   : > { %p37_p1 = scmp.ge.s32.totalorder %s35_s28, 3  ;;  %s74_s25 = sadd.s32 1, %s738_s14 }
  0x2d   : > { %p81_p2 = scmp.ne.s32.totalorder %s738_s14, %s734_s13  ;;  %p82_p4 = scmp.eq.s32.totalorder %s750_s17, 0 }
  0x2e   : > { %s1038_s28 = smov (%p37_p1, %s35_s28), 0  ;;  %p1025_p8 = scmp.ne.s32.totalorder %s1019_s21, 0 }
  0x2f   : > { %p873_p6 = por %p82_p4, %p81_p2  ;;  %s69_s30 = ssub.s32 %s746_s16, %s1038_s28 }
  0x30   : > { %p879_p11 = por %p1025_p8, %p81_p2  ;;  %p545_p12 = scmp.lt.s32.totalorder %s750_s17, 3 }
  0x31   : > { %p72_p10 = scmp.eq.s32.totalorder %s69_s30, 0  ;;  %s185_s26 = sand.u32 1, %s738_s14  }
  0x32   : > { %s490_s4 = sshll.u32 %s185_s26, 4  ;;  %s509_s6 = sshll.u32 %s746_s16, 8 }
  0x33   : > { %s888_s5 = scalar_select %p72_p10, %s738_s14, %s74_s25  }
  0x34   : > { %s894_s9 = scalar_lea.hbm %s1011_s1, %s509_s6  ;;  %s189_s21 = scalar_lea.vmem [#allocation5], %s490_s4 }
  0x35   : > { %s197_s18 = sshll.u32 %s189_s21, 4  ;;  %p900_p13 = pnand %p545_p12, %p873_p6  ;;  %s896_s18 = int_to_ptr.vmem [resolvable:$true] %s197_s18 }
  0x36   : > { %s904_s25 = scalar_lea.sflag [#allocation6], %s185_s26  ;;  %s634_s30 = scalar_lea.hbm %s894_s9, 256 }
  0x37   : > { %p635_p0 = scmp.ne.s32.totalorder %s894_s9, %s634_s30  ;;  %p636_p3 = pneg %p900_p13 }
  0x38   : > { %s639_s29 = scalar_lea.hbm %s1011_s1, 768  ;;  %p640_p9 = scmp.lt.u32.totalorder %s894_s9, %s1011_s1 }
  0x39   : > { %p637_p5 = pnand %p636_p3, %p635_p0  ;;  %p641_p1 = scmp.lt.u32.totalorder %s639_s29, %s634_s30 }
  0x3a   : > { %p643_p4 = scmp.lt.u32.totalorder %s634_s30, %s894_s9 }
  0x3b   : > { %p638_p7 = pneg %p637_p5  ;;  %p642_p2 = por %p641_p1, %p640_p9 }
  0x3d   : > { %p644_p6 = por %p643_p4, %p642_p2 }
  0x3f   : > { %p645_p8 = pnand %p644_p6, %p638_p7 }
  0x41   : > { %648 = shalt.err (!%p645_p8)
}
  0x42   : > { %s649_s26 = scalar_lea.vmem %s896_s18, 256  ;;  %s755_s21 = smov [#allocation5]  }
  0x43   : > { %p650_p12 = scmp.ne.s32.totalorder %s896_s18, %s649_s26  ;;  %s654_s4 = sshll.u32 %s755_s21, 4  ;;  %s655_s4 = int_to_ptr.vmem [resolvable:$false] %s654_s4 }
  0x44   : > { %s656_s6 = scalar_lea.vmem %s655_s4, 512  ;;  %p657_p5 = scmp.lt.s32.totalorder %s896_s18, %s655_s4 }
  0x45   : > { %p652_p10 = pnand %p650_p12, %p636_p3  ;;  %p658_p9 = scmp.lt.s32.totalorder %s656_s6, %s649_s26 }
  0x47   : > { %p653_p0 = pneg %p652_p10  ;;  %p659_p1 = por %p658_p9, %p657_p5 }
  0x49   : > { %p660_p2 = pnand %p659_p1, %p653_p0 }
  0x4b   : > { %663 = shalt.err (!%p660_p2)
}
  0x4c   : > { %539 = dma.hbm_to_vmem [thread:$0]  (!%p900_p13), %s894_s9, 256, %s896_s18, %s904_s25, %s753_s10, %s753_s10, %s754_s11  }
  0x4d   : > { %p1028_p3 = scmp.ne.s32.totalorder %s1022_s24, 0 }
  0x4e   : > { %p1029_p7 = scmp.ne.s32.totalorder (!%p1028_p3), %s1018_s20, 0 }
  0x4f   : > { %218 = sbr.rel (%p1028_p3) target bundleno = 333 (0x14d), region = 32 }
  0x56   : > { %717 = dma.done.wait (%p1029_p7), [#allocation3], 128  }
  0x57   : > { %719 = vsyncadd (%p1029_p7), [#allocation3], 4294967168  ;;  %s942_s30 = sand.u32 1, %s734_s13   ;;  %p1030_p4 = scmp.ne.s32.totalorder %s1020_s22, 0 }
  0x58   : > { %s495_s19 = sshll.u32 %s942_s30, 4  ;;  %s225_s29 = scalar_lea.sflag [#allocation6], %s942_s30 }
  0x59   : > { %s228_s7 = scalar_lea.vmem [#allocation5], %s495_s19 }
  0x5a   : > { %721 = dma.done.wait (%p1030_p4), %s225_s29, 256  }
  0x5b   : > { %723 = vsyncadd (%p1030_p4), %s225_s29, 4294967040  ;;  %v756_v0 = vmov 0.0   ;;  %vm757_vm0 = vmmov 0   ;;  %v603_v1 = vld [vmem:[%s228_s7] sm:$0xff]   ;;  %v604_v2 = vld [vmem:[%s228_s7 + $0x8] sm:$0xff]   ;;  %vm296_vm1 = vcmask 261120  }
  0x5c   : > { %516 = vmatprep.subr.bf16.mxu0 %v756_v0  ;;  %520 = vmatprep.mubr.msk.bf16.mxu0 %vm757_vm0, %v756_v0  ;;  %v605_v3 = vld [vmem:[#allocation2] sm:$0xff]   ;;  %p258_p13 = scmp.lt.s32.totalorder %s742_s15, 2  ;;  %s496_s22 = sshll.u32 %s942_s30, 3  ;;  %vm349_vm2 = vcmask 257024  }
  0x5d   : > { %517 = vmatpush3.bf16.msra.mxu0 %v603_v1  ;;  %s256_s9 = scalar_lea.vmem [#allocation7], %s496_s22  ;;  %s512_s25 = sshll.u32 %s742_s15, 7 }
  0x5e   : > { %518 = vmatprep.subr.bf16.mxu0 %v756_v0  ;;  %s259_s20 = scalar_select %p258_p13, %s742_s15, 2 }
  0x5f   : > { %s369_s18 = sshll.u32 %s256_s9, 4  ;;  %s960_s21 = scalar_lea.hbm %s1013_s3, %s512_s25  ;;  %s962_s18 = int_to_ptr.vmem [resolvable:$true] %s369_s18 }
  0x60   : > { %s263_s11 = scalar_lea.vmem %s1012_s2, %s259_s20  ;;  %s353_s4 = scalar_lea.sflag [#allocation4], %s942_s30 }
  0x61   : > { %519 = vmatpush3.bf16.msra.mxu0 %v604_v2  ;;  %v497_v4 = vld [vmem:[%s263_s11] ss:$0 sm:$0xff]  ;;  %s664_s15 = scalar_lea.vmem %s962_s18, 128  ;;  %s758_s6 = smov [#allocation7]  }
  0x62   : > { %p665_p6 = scmp.ne.s32.totalorder %s962_s18, %s664_s15  ;;  %s668_s19 = sshll.u32 %s758_s6, 4  ;;  %s669_s19 = int_to_ptr.vmem [resolvable:$false] %s668_s19 }
  0x63   : > { %s670_s29 = scalar_lea.vmem %s669_s19, 256  ;;  %p671_p10 = scmp.lt.s32.totalorder %s962_s18, %s669_s19 }
  0x64   : > { %521 = vmatmul.mubr.msk.bf16.vlgmr.msra.gmra.mrb[0].mxu0 %vm296_vm1, %v605_v3  ;;  %p666_p8 = pnand %p665_p6, %p879_p11  ;;  %p672_p0 = scmp.lt.s32.totalorder %s670_s29, %s664_s15 }
  0x66   : > { %p667_p12 = pneg %p666_p8  ;;  %p673_p5 = por %p672_p0, %p671_p10 }
  0x68   : > { %p674_p9 = pnand %p673_p5, %p667_p12 }
 0x137   : > { %v334_v5 = vpop.f32.mrb[0].mxu0 }
 0x138   : > { %v335_v6 = vadd.f32 %v497_v4, %v334_v5  ;;  %v522_v7 = vpop.f32.mrb[1].mxu0 }
 0x139   : > { %v337_v8 = vpop.f32.mrb[2].mxu0 }
 0x13a   : > { %v510_v9 = vpack.c.bf16 %v335_v6, %v335_v6  ;;  %v338_v10 = vadd.f32 %v497_v4, %v337_v8  ;;  %v523_v11 = vpop.f32.mrb[3].mxu0 }
 0x13c   : > { %350 = vst.msk [vmem:[%s256_s9] sm:$0xf] %vm349_vm2, %v510_v9  ;;  %v511_v12 = vpack.c.bf16 %v338_v10, %v338_v10 }
 0x13e   : > { %351 = vst.msk [vmem:[%s256_s9 + $0x4] sm:$0xf] %vm349_vm2, %v511_v12 }
 0x13f   : > { %677 = shalt.err (!%p674_p9)
}
 0x140   : > { %s678_s7 = scalar_lea.hbm %s960_s21, 128  ;;  %s682_s24 = scalar_lea.hbm %s1013_s3, 384 }
 0x141   : > { %p679_p1 = scmp.ne.s32.totalorder %s960_s21, %s678_s7  ;;  %p683_p7 = scmp.lt.u32.totalorder %s960_s21, %s1013_s3 }
 0x142   : > { %p684_p4 = scmp.lt.u32.totalorder %s682_s24, %s678_s7  ;;  %p686_p6 = scmp.lt.u32.totalorder %s678_s7, %s960_s21 }
 0x143   : > { %p680_p2 = pnand %p679_p1, %p879_p11 }
 0x144   : > { %p685_p13 = por %p684_p4, %p683_p7 }
 0x145   : > { %p681_p3 = pneg %p680_p2 }
 0x146   : > { %p687_p8 = por %p686_p6, %p685_p13 }
 0x148   : > { %p688_p12 = pnand %p687_p8, %p681_p3 }
 0x14a   : > { %691 = shalt.err (!%p688_p12)
}
 0x14b   : > { %s759_s9 = smov 64   ;;  %s760_s25 = smov 4  }
 0x14c   : > { %530 = dma.vmem_to_hbm [thread:$0]  (%p879_p11), %s962_s18, 128, %s960_s21, %s353_s4, %s759_s9, %s759_s9, %s760_s25  }
 0x14d PF: > { %p547_p10 = scmp.ge.s32.totalorder %s750_s17, 2  ;;  %s384_s8 = sand.u32 1, %s730_s12  }
 0x14e   : > { %p1031_p0 = scmp.ne.s32.totalorder %s1021_s23, 0  ;;  %s385_s26 = scalar_lea.sflag [#allocation4], %s384_s8 }
 0x150   : > { %p541_p5 = pnand %p547_p10, %p1031_p0 }
 0x152   : > { %725 = dma.done.wait (!%p541_p5), %s385_s26, 128  }
 0x153   : > { %727 = vsyncadd (!%p541_p5), %s385_s26, 4294967168  ;;  %s20_s17 = sadd.s32 1, %s750_s17   ;;  %s1032_s12 = smov %s734_s13 }
 0x154   : > { %p17_p9 = scmp.ge.s32.totalorder %s20_s17, 5   ;;  %s1033_s13 = smov %s738_s14 }
 0x155   : > { %s1034_s14 = smov %s888_s5  ;;  %s1035_s15 = smov %s746_s16 }
 0x156   : > { %s1036_s16 = smov %s1038_s28  ;;  %19 = sbr.rel (!%p17_p9) target bundleno = 7 (0x7), region = 86 }
 0x15d   :  { %390 = vsyncpa [#allocation3], 1 }
 0x15e   :  { %392 = vsyncpa [#allocation3 + $0x1], 1 }
 0x15f   :  { %393 = vsyncpa [#allocation6], 1 }
 0x160   :  { %395 = vsyncpa [#allocation6 + $0x1], 1 }
 0x161   :  { %396 = vsyncpa [#allocation4], 1 }
 0x162   :  { %398 = vsyncpa [#allocation4 + $0x1], 1 }

</bundles_post_ra>
